<compile_context>
chip_gen: v7x
topology: tpu7x:2x2x1
jax: 0.10.0
libtpu: 0.0.40
codegen_flags: <defaults>
</compile_context>

<pallas_src>
import functools

import jax
import jax.numpy as jnp
import numpy as np
from jax.experimental import pallas as pl
from jax.experimental.pallas import tpu as pltpu

_LANES = 128
# 8 f32-equivalent streams, double-buffered (conservative for both kernels).
_STREAM_BYTES_PER_ROW = 8 * 2 * _LANES * 4


# ---------------------------------------------------------------------------
# Generation-aware sizing
# ---------------------------------------------------------------------------
@functools.lru_cache(maxsize=None)
def _vmem_cap_bytes():
    try:
        return int(pltpu.get_tpu_info().vmem_capacity_bytes)
    except Exception:
        return 64 << 20   # conservative fallback = v7x per-TC VMEM


@functools.lru_cache(maxsize=None)
def _max_block_rows():
    cap = _vmem_cap_bytes()
    # leave >=16 MiB headroom (matters on v7x's 64 MiB), never more than 3/4 cap
    budget = min(cap - (16 << 20), int(cap * 0.75))
    rows = budget // _STREAM_BYTES_PER_ROW
    return int(max(256, min(8192, (rows // 8) * 8)))


def _vmem_limit_bytes(block_rows):
    cap = _vmem_cap_bytes()
    need = block_rows * _STREAM_BYTES_PER_ROW + (2 << 20)
    return int(min(max(need, 32 << 20), max(cap - (8 << 20), 32 << 20)))


def _pick_block_rows(rows, max_block_rows, min_grid=2):
    """Largest sublane-aligned block that fits the VMEM budget; the parallel
    row-block axis is split into >= min_grid blocks (v7x: 2 TCs) when rows allow."""
    block = min(rows, max_block_rows)
    if min_grid > 1 and rows >= 16:
        per_core = ((-(-rows // min_grid)) + 7) // 8 * 8
        block = min(block, max(8, per_core))
    if rows >= 8:
        block = max(8, (block // 8) * 8)
    return int(block), int(pl.cdiv(rows, block))


# ---------------------------------------------------------------------------
# Flatten / unflatten helpers (lane-dense (rows, 128) layout)
# ---------------------------------------------------------------------------
def _flatten_lanes(a, lanes=_LANES):
    flat = a.reshape(-1)
    pad = (-flat.size) % lanes
    if pad:
        flat = jnp.pad(flat, (0, pad))
    return flat.reshape(-1, lanes)


def _unflatten(a, feat_shape, total, lead=()):
    a = a.reshape(*lead, -1)
    if a.shape[-1] != total:
        a = a[..., :total]
    return a.reshape(*lead, *feat_shape)


# ---------------------------------------------------------------------------
# Per-timestep kernel (one pallas_call per SNode.forward call)
# ---------------------------------------------------------------------------
def _snode_step_kernel(x_ref, mem_ref, allspk_ref, summem_ref, th_ref,
                       mem_out_ref, allspk_out_ref, summem_out_ref, out_ref,
                       *, gamma):
    th = th_ref[0]                                       # f32 scalar from SMEM
    x = x_ref[...].astype(jnp.float32)
    mem = mem_ref[...] + x                               # integrate
    spike = jnp.clip(jnp.floor(mem / th), 0.0, float(gamma))   # quantize
    mem = mem - spike * th                               # soft reset
    mem_out_ref[...] = mem
    allspk_out_ref[...] = allspk_ref[...] + spike
    summem_out_ref[...] = summem_ref[...] + mem
    out_ref[...] = (spike * th).astype(out_ref.dtype)


@functools.partial(jax.jit, static_argnames=("gamma",), donate_argnums=(1, 2, 3))
def _snode_step_jit(x, mem_flat, allspk_flat, summem_flat, threshold, *, gamma):
    """One SNode timestep. State is flat f32 (rows, 128); x/out keep x's shape."""
    feat_shape = tuple(x.shape)
    total = int(x.size)

    x_flat = _flatten_lanes(x)
    rows, lanes = x_flat.shape
    block_rows, n_blocks = _pick_block_rows(rows, _max_block_rows())

    spec = pl.BlockSpec((block_rows, lanes), lambda i: (i, 0))
    smem_spec = pl.BlockSpec(memory_space=pltpu.MemorySpace.SMEM)
    st_sds = jax.ShapeDtypeStruct((rows, lanes), jnp.float32)
    out_sds = jax.ShapeDtypeStruct((rows, lanes), x.dtype)

    elems = rows * lanes
    itemsize = np.dtype(x.dtype).itemsize
    cost = pl.CostEstimate(flops=10 * elems, transcendentals=0,
                           bytes_accessed=int(elems * (2 * itemsize + 6 * 4)))

    mem_n, allspk_n, summem_n, out_flat = pl.pallas_call(
        functools.partial(_snode_step_kernel, gamma=int(gamma)),
        out_shape=(st_sds, st_sds, st_sds, out_sds),     # mem, all_spike, summem, out
        grid_spec=pltpu.PrefetchScalarGridSpec(
            num_scalar_prefetch=0,
            grid=(n_blocks,),
            in_specs=[spec, spec, spec, spec, smem_spec],
            out_specs=[spec, spec, spec, spec],
        ),
        # state streams update in place in HBM
        input_output_aliases={1: 0, 2: 1, 3: 2},
        compiler_params=pltpu.CompilerParams(
            dimension_semantics=("parallel",),
            vmem_limit_bytes=_vmem_limit_bytes(block_rows)),
        cost_estimate=cost,
    )(x_flat, mem_flat, allspk_flat, summem_flat, threshold)

    return mem_n, allspk_n, summem_n, _unflatten(out_flat, feat_shape, total)


# ---------------------------------------------------------------------------
# Fused multi-timestep kernel: state accumulates in VMEM-resident f32 output
# blocks across the "arbitrary" time axis (x in / out out only per step).
# ---------------------------------------------------------------------------
def _snode_seq_kernel(x_ref, th_ref, out_ref, mem_ref, allspk_ref, summem_ref,
                      *, gamma):
    t = pl.program_id(1)

    @pl.when(t == 0)
    def _():
        mem_ref[...] = jnp.zeros_like(mem_ref)
        allspk_ref[...] = jnp.zeros_like(allspk_ref)
        summem_ref[...] = jnp.zeros_like(summem_ref)

    th = th_ref[0]
    x = x_ref[0].astype(jnp.float32)
    mem = mem_ref[...] + x
    spike = jnp.clip(jnp.floor(mem / th), 0.0, float(gamma))
    mem = mem - spike * th
    out_ref[0] = (spike * th).astype(out_ref.dtype)
    mem_ref[...] = mem
    allspk_ref[...] = allspk_ref[...] + spike
    summem_ref[...] = summem_ref[...] + mem


@functools.partial(jax.jit, static_argnames=("gamma",))
def _snode_run_sequence_jit(xs, threshold, *, gamma):
    T = xs.shape[0]
    feat_shape = tuple(xs.shape[1:])
    total = int(np.prod(feat_shape))

    flat = xs.reshape(T, -1)
    pad = (-total) % _LANES
    if pad:
        flat = jnp.pad(flat, ((0, 0), (0, pad)))
    rows = flat.shape[1] // _LANES
    flat = flat.reshape(T, rows, _LANES)

    block_rows, n_row_blocks = _pick_block_rows(rows, _max_block_rows())

    x_spec = pl.BlockSpec((1, block_rows, _LANES), lambda i, t: (t, i, 0))
    st_spec = pl.BlockSpec((block_rows, _LANES), lambda i, t: (i, 0))
    smem_spec = pl.BlockSpec(memory_space=pltpu.MemorySpace.SMEM)
    out_sds = jax.ShapeDtypeStruct((T, rows, _LANES), xs.dtype)
    st_sds = jax.ShapeDtypeStruct((rows, _LANES), jnp.float32)

    elems = rows * _LANES
    itemsize = np.dtype(xs.dtype).itemsize
    cost = pl.CostEstimate(flops=10 * T * elems, transcendentals=0,
                           bytes_accessed=int(T * elems * 2 * itemsize + 3 * elems * 4))

    outs, mem, allspk, summem = pl.pallas_call(
        functools.partial(_snode_seq_kernel, gamma=int(gamma)),
        out_shape=(out_sds, st_sds, st_sds, st_sds),
        grid_spec=pltpu.PrefetchScalarGridSpec(
            num_scalar_prefetch=0,
            grid=(n_row_blocks, T),                      # time axis last, "arbitrary"
            in_specs=[x_spec, smem_spec],
            out_specs=[x_spec, st_spec, st_spec, st_spec],
        ),
        compiler_params=pltpu.CompilerParams(
            dimension_semantics=("parallel", "arbitrary"),
            vmem_limit_bytes=_vmem_limit_bytes(block_rows)),
        cost_estimate=cost,
    )(flat, threshold)

    return (_unflatten(outs, feat_shape, total, lead=(T,)),
            _unflatten(mem, feat_shape, total),
            _unflatten(allspk, feat_shape, total),
            _unflatten(summem, feat_shape, total))


def snode_run_sequence(xs, *, threshold, gamma):
    """Run T SNode timesteps from zero state in one pallas_call.
    xs: (T, *feat). Returns (outs (T, *feat), mem, all_spike, summem) with f32 state."""
    th = jnp.full((1,), threshold, dtype=jnp.float32)
    return _snode_run_sequence_jit(xs, th, gamma=int(gamma))


# ---------------------------------------------------------------------------
# Stateful wrapper mirroring the PyTorch SNode (fixed-threshold branch)
# ---------------------------------------------------------------------------
class SNodePallas:
    def __init__(self, smode=True, gamma=5, maxThreshold=1.0, VthHand=1.0,
                 useDET=False, useDTT=False, useSC=None, layer_index=1):
        self.smode = smode
        self.gamma = gamma
        self.maxThreshold = float(maxThreshold)
        self.VthHand = VthHand      # NOTE: default 1.0 (PyTorch default False -> threshold 0)
        self.useDET = useDET
        self.useDTT = useDTT
        self.useSC = useSC
        self.layer_index = layer_index
        self.t = 0
        self.threshold = float(maxThreshold)
        self._feat_shape = None
        self._total = 0
        self._mem = None            # flat (rows, 128) f32 state, lives in this layout
        self._allspk = None
        self._summem = None
        # TODO(synk): DTT/DET adaptive thresholds and useSC confidence masking need
        # hyperparameters.txt / neuron_confidence_*.txt and torch.rand masks; only
        # the fixed-threshold (VthHand) branch is implemented in-kernel.

    def _unflat(self, a):
        if a is None:
            return None
        return _unflatten(a, self._feat_shape, self._total)

    @property
    def mem(self):
        return self._unflat(self._mem)

    @property
    def all_spike(self):
        return self._unflat(self._allspk)

    @property
    def summem(self):
        return self._unflat(self._summem)

    @property
    def sumspike(self):
        # In the fixed-threshold branch sumspike == all_spike; aliased instead of
        # carrying a redundant HBM stream through the kernel.
        return self.all_spike

    @property
    def last_mem(self):
        return self.mem

    @property
    def Vm(self):
        # Lazy: computed only if somebody reads it (saves a full-array pass/step).
        if self.t == 0 or self._summem is None:
            return 0.0
        return self.summem / self.t

    def __call__(self, x):
        if not self.smode:
            return jnp.maximum(x, 0.0)          # nn.ReLU path (cold, plain JAX)

        if self.t == 0:
            if self.VthHand != -1:
                self.threshold = float(self.VthHand) * self.maxThreshold
            else:
                self.threshold = 1.0 * self.maxThreshold
            self._feat_shape = tuple(x.shape)
            self._total = int(np.prod(self._feat_shape))
            rows = int(pl.cdiv(self._total, _LANES))
            # three distinct buffers so each can be donated/aliased independently
            self._mem = jnp.zeros((rows, _LANES), jnp.float32)
            self._allspk = jnp.zeros((rows, _LANES), jnp.float32)
            self._summem = jnp.zeros((rows, _LANES), jnp.float32)

        th = jnp.full((1,), self.threshold, dtype=jnp.float32)
        self._mem, self._allspk, self._summem, out = _snode_step_jit(
            x, self._mem, self._allspk, self._summem, th, gamma=int(self.gamma))

        self.t += 1
        return out


# ---------------------------------------------------------------------------
# NumPy reference (same recurrence, f32 everywhere)
# ---------------------------------------------------------------------------
def _np_snode_sequence(xs, threshold, gamma):
    th = np.float32(threshold)
    mem = np.zeros_like(xs[0])
    all_spike = np.zeros_like(xs[0])
    summem = np.zeros_like(xs[0])
    outs = []
    for x in xs:
        mem = mem + x
        spike = np.clip(np.floor(mem / th), np.float32(0.0), np.float32(gamma))
        mem = mem - spike * th
        outs.append(spike * th)
        all_spike = all_spike + spike
        summem = summem + mem
    return np.stack(outs), mem, all_spike, summem


if __name__ == "__main__":
    key = jax.random.PRNGKey(0)
    k1, k2, k3, k4 = jax.random.split(key, 4)

    # --- per-step stateful path (one pallas_call per timestep, like SNode.forward)
    x1 = jax.random.normal(k1, (2, 4, 16, 16), dtype=jnp.float32) * 2.0
    x2 = jax.random.normal(k2, (2, 4, 16, 16), dtype=jnp.float32) * 2.0

    node = SNodePallas(smode=True, gamma=5, maxThreshold=1.0, VthHand=1.0)
    out1 = node(x1)          # t = 0
    out2 = node(x2)          # t = 1 (carried membrane potential)
    jax.block_until_ready(out2)

    refs, mem_np, allspk_np, summem_np = _np_snode_sequence(
        np.stack([np.asarray(x1), np.asarray(x2)]), 1.0, 5)
    np.testing.assert_allclose(np.asarray(out1), refs[0], rtol=1e-6, atol=1e-6)
    np.testing.assert_allclose(np.asarray(out2), refs[1], rtol=1e-6, atol=1e-6)
    np.testing.assert_allclose(np.asarray(node.mem), mem_np, rtol=1e-6, atol=1e-6)
    np.testing.assert_allclose(np.asarray(node.sumspike), allspk_np, rtol=1e-6, atol=1e-6)
    np.testing.assert_allclose(np.asarray(node.summem), summem_np, rtol=1e-6, atol=1e-6)

    # --- fused multi-timestep path (state VMEM-resident across T steps)
    T = 8
    xs = jax.random.normal(k3, (T, 2, 4, 16, 16), dtype=jnp.float32) * 2.0
    outs, mem_f, allspk_f, summem_f = snode_run_sequence(xs, threshold=0.5, gamma=5)
    jax.block_until_ready(outs)

    refs2, mem2, allspk2, summem2 = _np_snode_sequence(np.asarray(xs), 0.5, 5)
    np.testing.assert_allclose(np.asarray(outs), refs2, rtol=1e-6, atol=1e-6)
    np.testing.assert_allclose(np.asarray(mem_f), mem2, rtol=1e-6, atol=1e-6)
    np.testing.assert_allclose(np.asarray(allspk_f), allspk2, rtol=1e-6, atol=1e-6)
    np.testing.assert_allclose(np.asarray(summem_f), summem2, rtol=1e-6, atol=1e-6)

    # --- padding path (numel % 128 != 0): state stays flat/padded, only x padded
    xp = jax.random.normal(k4, (2, 3, 5, 7), dtype=jnp.float32) * 2.0
    node2 = SNodePallas(smode=True, gamma=5, maxThreshold=1.0, VthHand=0.7)
    outp = node2(xp)
    jax.block_until_ready(outp)
    refp, memp, allp, sump = _np_snode_sequence(np.asarray(xp)[None], 0.7, 5)
    np.testing.assert_allclose(np.asarray(outp), refp[0], rtol=1e-6, atol=1e-6)
    np.testing.assert_allclose(np.asarray(node2.mem), memp, rtol=1e-6, atol=1e-6)
    np.testing.assert_allclose(np.asarray(node2.all_spike), allp, rtol=1e-6, atol=1e-6)

    print("KERNEL_OK")
</pallas_src>

<mosaic_0001>
module attributes {stable_mosaic.version = 11 : i64} {
  func.func @_snode_step_kernel(%arg0: i32, %arg1: memref<8x128xf32, #tpu.memory_space<vmem>>, %arg2: memref<8x128xf32, #tpu.memory_space<vmem>>, %arg3: memref<8x128xf32, #tpu.memory_space<vmem>>, %arg4: memref<8x128xf32, #tpu.memory_space<vmem>>, %arg5: memref<1xf32, #tpu.memory_space<smem>>, %arg6: memref<8x128xf32, #tpu.memory_space<vmem>>, %arg7: memref<8x128xf32, #tpu.memory_space<vmem>>, %arg8: memref<8x128xf32, #tpu.memory_space<vmem>>, %arg9: memref<8x128xf32, #tpu.memory_space<vmem>>) attributes {dimension_semantics = [#tpu.dimension_semantics<parallel>], iteration_bounds = array<i64: 2>, scalar_prefetch = 0 : i64, scratch_operands = 0 : i64, tpu.core_type = #tpu.core_type<tc>, window_params = [{transform_indices = @transform_0, window_bounds = array<i64: 8, 128>}, {transform_indices = @transform_1, window_bounds = array<i64: 8, 128>}, {transform_indices = @transform_2, window_bounds = array<i64: 8, 128>}, {transform_indices = @transform_3, window_bounds = array<i64: 8, 128>}, {transform_indices = @transform_4, window_bounds = array<i64: 1>}, {transform_indices = @transform_5, window_bounds = array<i64: 8, 128>}, {transform_indices = @transform_6, window_bounds = array<i64: 8, 128>}, {transform_indices = @transform_7, window_bounds = array<i64: 8, 128>}, {transform_indices = @transform_8, window_bounds = array<i64: 8, 128>}]} {
    %c0 = arith.constant 0 : index
    %0 = memref.load %arg5[%c0] : memref<1xf32, #tpu.memory_space<smem>>
    %c0_0 = arith.constant 0 : index
    %c0_1 = arith.constant 0 : index
    %1 = vector.load %arg1[%c0_0, %c0_1] : memref<8x128xf32, #tpu.memory_space<vmem>>, vector<8x128xf32>
    %c0_2 = arith.constant 0 : index
    %c0_3 = arith.constant 0 : index
    %2 = vector.load %arg2[%c0_2, %c0_3] : memref<8x128xf32, #tpu.memory_space<vmem>>, vector<8x128xf32>
    %3 = arith.addf %2, %1 : vector<8x128xf32>
    %4 = vector.broadcast %0 : f32 to vector<8x128xf32>
    %5 = arith.divf %3, %4 : vector<8x128xf32>
    %6 = math.floor %5 : vector<8x128xf32>
    %cst = arith.constant 0.000000e+00 : f32
    %cst_4 = arith.constant 5.000000e+00 : f32
    %7 = vector.broadcast %cst : f32 to vector<8x128xf32>
    %8 = arith.maximumf %7, %6 : vector<8x128xf32>
    %9 = vector.broadcast %cst_4 : f32 to vector<8x128xf32>
    %10 = arith.minimumf %9, %8 : vector<8x128xf32>
    %11 = vector.broadcast %0 : f32 to vector<8x128xf32>
    %12 = arith.mulf %10, %11 : vector<8x128xf32>
    %13 = arith.subf %3, %12 : vector<8x128xf32>
    %c0_5 = arith.constant 0 : index
    %c0_6 = arith.constant 0 : index
    %14 = vector.load %arg6[%c0_5, %c0_6] : memref<8x128xf32, #tpu.memory_space<vmem>>, vector<8x128xf32>
    tpu.vector_store %arg6[%c0_5, %c0_6], %13 {strides = array<i32>} : memref<8x128xf32, #tpu.memory_space<vmem>>, vector<8x128xf32>,
    %c0_7 = arith.constant 0 : index
    %c0_8 = arith.constant 0 : index
    %15 = vector.load %arg3[%c0_7, %c0_8] : memref<8x128xf32, #tpu.memory_space<vmem>>, vector<8x128xf32>
    %16 = arith.addf %15, %10 : vector<8x128xf32>
    %c0_9 = arith.constant 0 : index
    %c0_10 = arith.constant 0 : index
    %17 = vector.load %arg7[%c0_9, %c0_10] : memref<8x128xf32, #tpu.memory_space<vmem>>, vector<8x128xf32>
    tpu.vector_store %arg7[%c0_9, %c0_10], %16 {strides = array<i32>} : memref<8x128xf32, #tpu.memory_space<vmem>>, vector<8x128xf32>,
    %c0_11 = arith.constant 0 : index
    %c0_12 = arith.constant 0 : index
    %18 = vector.load %arg4[%c0_11, %c0_12] : memref<8x128xf32, #tpu.memory_space<vmem>>, vector<8x128xf32>
    %19 = arith.addf %18, %13 : vector<8x128xf32>
    %c0_13 = arith.constant 0 : index
    %c0_14 = arith.constant 0 : index
    %20 = vector.load %arg8[%c0_13, %c0_14] : memref<8x128xf32, #tpu.memory_space<vmem>>, vector<8x128xf32>
    tpu.vector_store %arg8[%c0_13, %c0_14], %19 {strides = array<i32>} : memref<8x128xf32, #tpu.memory_space<vmem>>, vector<8x128xf32>,
    %21 = vector.broadcast %0 : f32 to vector<8x128xf32>
    %22 = arith.mulf %10, %21 : vector<8x128xf32>
    %c0_15 = arith.constant 0 : index
    %c0_16 = arith.constant 0 : index
    %23 = vector.load %arg9[%c0_15, %c0_16] : memref<8x128xf32, #tpu.memory_space<vmem>>, vector<8x128xf32>
    tpu.vector_store %arg9[%c0_15, %c0_16], %22 {strides = array<i32>} : memref<8x128xf32, #tpu.memory_space<vmem>>, vector<8x128xf32>,
    return
  }
  func.func @transform_0(%arg0: i32) -> (i32, i32) {
    %c0_i32 = arith.constant 0 : i32
    %c0_i32_0 = arith.constant 0 : i32
    return %arg0, %c0_i32 : i32, i32
  }
  func.func @transform_1(%arg0: i32) -> (i32, i32) {
    %c0_i32 = arith.constant 0 : i32
    %c0_i32_0 = arith.constant 0 : i32
    return %arg0, %c0_i32 : i32, i32
  }
  func.func @transform_2(%arg0: i32) -> (i32, i32) {
    %c0_i32 = arith.constant 0 : i32
    %c0_i32_0 = arith.constant 0 : i32
    return %arg0, %c0_i32 : i32, i32
  }
  func.func @transform_3(%arg0: i32) -> (i32, i32) {
    %c0_i32 = arith.constant 0 : i32
    %c0_i32_0 = arith.constant 0 : i32
    return %arg0, %c0_i32 : i32, i32
  }
  func.func @transform_4(%arg0: i32) -> i32 {
    %c0_i32 = arith.constant 0 : i32
    %c0_i32_0 = arith.constant 0 : i32
    return %c0_i32 : i32
  }
  func.func @transform_5(%arg0: i32) -> (i32, i32) {
    %c0_i32 = arith.constant 0 : i32
    %c0_i32_0 = arith.constant 0 : i32
    return %arg0, %c0_i32 : i32, i32
  }
  func.func @transform_6(%arg0: i32) -> (i32, i32) {
    %c0_i32 = arith.constant 0 : i32
    %c0_i32_0 = arith.constant 0 : i32
    return %arg0, %c0_i32 : i32, i32
  }
  func.func @transform_7(%arg0: i32) -> (i32, i32) {
    %c0_i32 = arith.constant 0 : i32
    %c0_i32_0 = arith.constant 0 : i32
    return %arg0, %c0_i32 : i32, i32
  }
  func.func @transform_8(%arg0: i32) -> (i32, i32) {
    %c0_i32 = arith.constant 0 : i32
    %c0_i32_0 = arith.constant 0 : i32
    return %arg0, %c0_i32 : i32, i32
  }
}

</mosaic_0001>

<bundles_post_ra>
// kernel: _snode_step_jit.1
= control target key start
LH: loop header
LB: loop body
LE: loop exit
PB: predicated region body
PF: predicated region fallthrough
CT: control target
= control target key end

     0   :  { %s667_s29 = smov 0   ;;  %s702_s0 = inlined_call_operand.vmem [shape: f32[16,128], index: 0, kind: input, shape index: {}]   ;;  %s703_s1 = inlined_call_operand.vmem [shape: f32[16,128], index: 1, kind: input, shape index: {}, may-alias: {1,5}]   ;;  %s704_s2 = inlined_call_operand.vmem [shape: f32[16,128], index: 2, kind: input, shape index: {}, may-alias: {2,6}]   ;;  %s705_s3 = inlined_call_operand.vmem [shape: f32[16,128], index: 3, kind: input, shape index: {}, may-alias: {3,7}]   ;;  %s706_s4 = inlined_call_operand.<no memory space> [shape: f32[1], index: 4, kind: input, shape index: {}]   ;;  %s707_s5 = inlined_call_operand.vmem [shape: f32[16,128], index: 5, kind: output, shape index: {0}, may-alias: {1,5}]   ;;  %s708_s6 = inlined_call_operand.vmem [shape: f32[16,128], index: 6, kind: output, shape index: {1}, may-alias: {2,6}]   ;;  %s709_s7 = inlined_call_operand.vmem [shape: f32[16,128], index: 7, kind: output, shape index: {2}, may-alias: {3,7}]   ;;  %s710_s8 = inlined_call_operand.vmem [shape: f32[16,128], index: 8, kind: output, shape index: {3}]  }
   0x1   :  { %14 = sst [smem:[#allocation2]] %s706_s4 }
   0x2 LB: > { %s586_s30 = sadd.s32 4294967295, %s617_s29   ;;  %p590_p0 = scmp.ge.s32.totalorder %s617_s29, 1  ;;  %s617_s29 = sphi %s667_s29, %s20_s29  }
   0x3   : > { %p296_p1 = scmp.lt.s32.totalorder %s617_s29, 3 }
   0x5   : > { %p297_p2 = pnand %p590_p0, %p296_p1 }
   0x6   : > { %p352_p3 = scmp.lt.s32.totalorder (!%p297_p2), %s586_s30, 1  ;;  %s384_s9 = sld [smem:[#allocation2]] (!%p297_p2) }
   0x7   : > { %300 = sbr.rel (%p297_p2) target bundleno = 39 (0x27), region = 40 }
   0xc   : > { %v388_v0 = vstv (!%p297_p2), %s384_s9 }
   0xd   : > { %609 = vrcp.f32 (!%p297_p2), %v388_v0 }
   0xe   : > { %s712_s30 = smov (!%p352_p3, %s586_s30), 1 }
   0xf   : > { %s591_s10 = sshll.u32 %s712_s30, 3 }
  0x10   : > { %s355_s12 = scalar_lea.vmem %s702_s0, %s591_s10  ;;  %s359_s15 = scalar_lea.vmem %s703_s1, %s591_s10 }
  0x11   : > { %v385_v1 = vld [vmem:[%s355_s12] sm:$0xff]  ;;  %s363_s18 = scalar_lea.vmem %s704_s2, %s591_s10  ;;  %s367_s21 = scalar_lea.vmem %s705_s3, %s591_s10 }
  0x12   : > { %v386_v2 = vld [vmem:[%s359_s15] sm:$0xff]  ;;  %s375_s24 = scalar_lea.vmem %s708_s6, %s591_s10  ;;  %s383_s27 = scalar_lea.vmem %s710_s8, %s591_s10 }
  0x13   : > { %v387_v3 = vadd.f32 %v386_v2, %v385_v1  ;;  %v397_v8 = vld [vmem:[%s363_s18] sm:$0xff]  ;;  %s371_s9 = scalar_lea.vmem %s707_s5, %s591_s10  ;;  %s379_s12 = scalar_lea.vmem %s709_s7, %s591_s10 }
  0x14   : > { %v400_v12 = vld [vmem:[%s367_s21] sm:$0xff] }
  0x17   : > { %v610_v4 = vpop.eup %609 }
  0x18   : > { %v390_v5 = vmul.f32 %v610_v4, %v387_v3 }
  0x1a   : > { %v391_v6 = vfloor.f32 %v390_v5 }
  0x1c   : > { %v392_v7 = vmax.f32 %v391_v6, 0.0 }
  0x1e   : > { %v393_v9 = vmin.f32 %v392_v7, 5.0 }
  0x20   : > { %v394_v10 = vmul.f32 %v393_v9, %v388_v0  ;;  %v398_v11 = vadd.f32 %v397_v8, %v393_v9 }
  0x22   : > { %v395_v13 = vsub.f32 %v387_v3, %v394_v10  ;;  %399 = vst [vmem:[%s375_s24] sm:$0xff] %v398_v11  ;;  %403 = vst [vmem:[%s383_s27] sm:$0xff] %v394_v10 }
  0x24   : > { %396 = vst [vmem:[%s371_s9] sm:$0xff] %v395_v13  ;;  %v401_v14 = vadd.f32 %v400_v12, %v395_v13 }
  0x26   : > { %402 = vst [vmem:[%s379_s12] sm:$0xff] %v401_v14 }
  0x27 PF: > { %s20_s29 = sadd.s32 1, %s617_s29  }
  0x28   : > { %p17_p4 = scmp.ge.s32.totalorder %s20_s29, 4  }
  0x2a   :  { %19 = sbr.rel (!%p17_p4) target bundleno = 2 (0x2), region = 115 }

</bundles_post_ra>
